<compile_context>
chip_gen: v5e
topology: v5e:2x2
jax: 0.10.0
libtpu: 0.0.40
codegen_flags: <defaults>
</compile_context>

<pallas_src>
import functools

import jax
import jax.numpy as jnp
from jax.experimental import pallas as pl
from jax.experimental.pallas import tpu as pltpu


def ui2vec_kernel(text_ref, cls_ref, mask_ref, wt_ref, wc_ref, bias_ref, out_ref):
    """out = mask * (text @ Wt + cls @ Wc) + bias for one batch tile.

    text/cls/Wt/Wc are bf16 (MXU-native); accumulation, mask multiply and bias add
    run in f32 (preferred_element_type), matching the PyTorch f32 numerics closely.
    """
    # (block_b, D_text) @ (D_text, D_out): the dominant MXU matmul.
    acc = jnp.dot(text_ref[...], wt_ref[...], preferred_element_type=jnp.float32)
    # (block_b, D_cls) @ (D_cls, D_out): tiny-K matmul replacing the concat -- the
    # class columns of the Linear applied directly (keeps the output lane-dense).
    acc = acc + jnp.dot(cls_ref[...], wc_ref[...], preferred_element_type=jnp.float32)
    # Rows whose text was '' are zeroed *before* the Linear, so the bias still adds.
    out_ref[...] = (acc * mask_ref[...] + bias_ref[...]).astype(out_ref.dtype)


_SUBLANE = 16  # bf16 sublane packing; also a multiple of the f32 sublane count (8)


def _round_up(x, m):
    return (x + m - 1) // m * m


def _choose_block_b(B, block_b):
    block_b = _round_up(max(block_b, _SUBLANE), _SUBLANE)
    # v7x has 2 TensorCores: make sure the batch grid has >= 2 tiles so
    # dimension_semantics=("parallel",) can shard batch tiles across both.
    if B > _SUBLANE and block_b >= B:
        block_b = _round_up(pl.cdiv(B, 2), _SUBLANE)
    return min(block_b, _round_up(B, _SUBLANE))


def prepare_ui2vec_params(embedding_table, weight, bias, *, compute_dtype=jnp.bfloat16):
    """One-time (init-time) parameter prep.

    Splits/transposes/casts the nn.Linear weight and casts the nn.Embedding table.
    Hoisted out of the hot path: the ~2.3 MB transpose+cast would otherwise be a
    separate, un-hidden XLA op paid on every forward call.
    """
    _, d_cls = embedding_table.shape
    d_out, d_in = weight.shape
    d_text = d_in - d_cls
    wt = jnp.asarray(weight[:, :d_text].T, compute_dtype)        # [D_text, D_out]
    wc = jnp.asarray(weight[:, d_text:].T, compute_dtype)        # [D_cls,  D_out]
    bias2d = jnp.asarray(bias, jnp.float32).reshape(1, d_out)    # [1, D_out] (f32)
    emb_table = jnp.asarray(embedding_table, compute_dtype)      # [C, D_cls]
    return wt, wc, bias2d, emb_table


@functools.partial(jax.jit, static_argnames=("block_b", "out_dtype"))
def ui2vec_forward(text_emb, class_name, empty_mask, wt, wc, bias2d, emb_table,
                   *, block_b=512, out_dtype=jnp.float32):
    """UI2Vec forward.

    text_emb    [B, D_text]        precomputed BERT sentence embeddings (any float dtype)
    class_name  i32[B]             UI class ids
    empty_mask  f32[B]             0.0 where the text was '', else 1.0
    wt, wc, bias2d, emb_table      from prepare_ui2vec_params()
    returns     out_dtype[B, D_out]
    """
    B, D_text = text_emb.shape
    D_cls, D_out = wc.shape
    assert wt.shape == (D_text, D_out)
    compute_dtype = wt.dtype

    # Dominant streams in bf16 (MXU-native, halves the HBM read); mask/bias stay f32.
    text_emb = text_emb.astype(compute_dtype)
    # nn.Embedding lookup on the ~tiny table: trivial gather in plain XLA (don't
    # spend the MXU on a (B, num_classes) one-hot matmul in-kernel).
    class_emb = jnp.take(emb_table, class_name.astype(jnp.int32), axis=0)  # [B, D_cls]
    mask2d = jnp.asarray(empty_mask, jnp.float32).reshape(B, 1)            # [B, 1]

    block_b = _choose_block_b(B, block_b)
    # No padded copy of the text stream: a partial last tile is handled by Pallas
    # edge-block masking (per-row math, so OOB rows never contaminate valid rows).
    grid = (pl.cdiv(B, block_b),)

    return pl.pallas_call(
        ui2vec_kernel,
        out_shape=jax.ShapeDtypeStruct((B, D_out), out_dtype),
        grid=grid,
        in_specs=[
            pl.BlockSpec((block_b, D_text), lambda i: (i, 0)),   # text emb (pipelined)
            pl.BlockSpec((block_b, D_cls), lambda i: (i, 0)),    # class emb (tiny)
            pl.BlockSpec((block_b, 1), lambda i: (i, 0)),        # empty-text mask
            pl.BlockSpec((D_text, D_out), lambda i: (0, 0)),     # Wt  (resident)
            pl.BlockSpec((D_cls, D_out), lambda i: (0, 0)),      # Wc  (resident)
            pl.BlockSpec((1, D_out), lambda i: (0, 0)),          # bias (resident)
        ],
        out_specs=pl.BlockSpec((block_b, D_out), lambda i: (i, 0)),
        compiler_params=pltpu.CompilerParams(
            # Batch tiles are independent -> shard across TensorCores on v7x.
            dimension_semantics=("parallel",)),
    )(text_emb, class_emb, mask2d, wt, wc, bias2d)


def reference_forward(text_emb, class_name, empty_mask, embedding_table, weight, bias):
    """Plain-XLA f32 reference matching the PyTorch UI2Vec.forward."""
    class_emb = embedding_table[class_name]                       # nn.Embedding
    x = jnp.concatenate([text_emb, class_emb], axis=1)            # torch.cat
    x = x * empty_mask.reshape(-1, 1)                             # zero rows, text==''
    return x @ weight.T + bias                                    # nn.Linear


if __name__ == "__main__":
    # Small shapes consistent with the module (bert_size scaled down; class dims kept).
    B = 32
    BERT_SIZE = 256      # stand-in for bert_size=768 (still a multiple of 128)
    NUM_CLASSES = 26
    CLASS_EMB = 6

    key = jax.random.PRNGKey(0)
    k_text, k_tab, k_ids, k_w, k_b = jax.random.split(key, 5)

    text_emb = jax.random.normal(k_text, (B, BERT_SIZE), dtype=jnp.float32)
    embedding_table = jax.random.normal(k_tab, (NUM_CLASSES, CLASS_EMB),
                                        dtype=jnp.float32)
    class_name = jax.random.randint(k_ids, (B,), 0, NUM_CLASSES, dtype=jnp.int32)
    weight = 0.05 * jax.random.normal(k_w, (BERT_SIZE, BERT_SIZE + CLASS_EMB),
                                      dtype=jnp.float32)
    bias = 0.05 * jax.random.normal(k_b, (BERT_SIZE,), dtype=jnp.float32)

    # Pretend texts at rows 1 and 5 are the empty string '' -> mask 0.0 there
    # (emulates the python `if text[index] == ''` loop in UIEmbedder.forward).
    empty_mask = jnp.ones((B,), jnp.float32).at[1].set(0.0).at[5].set(0.0)

    # One-time parameter prep (init-time, outside the hot path).
    wt, wc, bias2d, emb_table = prepare_ui2vec_params(embedding_table, weight, bias)

    # block_b=16 -> grid=(2,): exercises the batch-tiled, two-TensorCore path.
    out = ui2vec_forward(text_emb, class_name, empty_mask, wt, wc, bias2d, emb_table,
                         block_b=16)
    out = jax.block_until_ready(out)

    ref = reference_forward(text_emb, class_name, empty_mask, embedding_table,
                            weight, bias)
    assert out.shape == (B, BERT_SIZE)
    # bf16 inputs / f32 accumulation vs the full-f32 reference: ~1e-2-level abs error.
    max_err = float(jnp.max(jnp.abs(out - ref)))
    assert max_err < 1e-1, f"max abs err {max_err}"
    print("KERNEL_OK")
</pallas_src>

<mosaic_0001>
module attributes {stable_mosaic.version = 11 : i64} {
  func.func @ui2vec_kernel(%arg0: i32, %arg1: memref<16x256xbf16, #tpu.memory_space<vmem>>, %arg2: memref<16x6xbf16, #tpu.memory_space<vmem>>, %arg3: memref<16x1xf32, #tpu.memory_space<vmem>>, %arg4: memref<256x256xbf16, #tpu.memory_space<vmem>>, %arg5: memref<6x256xbf16, #tpu.memory_space<vmem>>, %arg6: memref<1x256xf32, #tpu.memory_space<vmem>>, %arg7: memref<16x256xf32, #tpu.memory_space<vmem>>) attributes {dimension_semantics = [#tpu.dimension_semantics<parallel>], iteration_bounds = array<i64: 2>, scalar_prefetch = 0 : i64, scratch_operands = 0 : i64, tpu.core_type = #tpu.core_type<tc>, window_params = [{transform_indices = @transform_0, window_bounds = array<i64: 16, 256>}, {transform_indices = @transform_1, window_bounds = array<i64: 16, 6>}, {transform_indices = @transform_2, window_bounds = array<i64: 16, 1>}, {pipeline_mode = #tpu.pipeline_mode<synchronous>, transform_indices = @transform_3, window_bounds = array<i64: 256, 256>}, {pipeline_mode = #tpu.pipeline_mode<synchronous>, transform_indices = @transform_4, window_bounds = array<i64: 6, 256>}, {pipeline_mode = #tpu.pipeline_mode<synchronous>, transform_indices = @transform_5, window_bounds = array<i64: 1, 256>}, {transform_indices = @transform_6, window_bounds = array<i64: 16, 256>}]} {
    %c0 = arith.constant 0 : index
    %c0_0 = arith.constant 0 : index
    %0 = vector.load %arg1[%c0, %c0_0] : memref<16x256xbf16, #tpu.memory_space<vmem>>, vector<16x256xbf16>
    %c0_1 = arith.constant 0 : index
    %c0_2 = arith.constant 0 : index
    %1 = vector.load %arg4[%c0_1, %c0_2] : memref<256x256xbf16, #tpu.memory_space<vmem>>, vector<256x256xbf16>
    %cst = arith.constant dense<0.000000e+00> : vector<16x256xf32>
    %2 = tpu.matmul %0, %1, %cst {dimension_numbers = #tpu.dot_dimension_numbers<[1], [0], [0], [1], [0, 0, 1, 1], [], []>} : vector<16x256xbf16>, vector<256x256xbf16>, vector<16x256xf32> -> vector<16x256xf32>
    %c0_3 = arith.constant 0 : index
    %c0_4 = arith.constant 0 : index
    %3 = vector.load %arg2[%c0_3, %c0_4] : memref<16x6xbf16, #tpu.memory_space<vmem>>, vector<16x6xbf16>
    %c0_5 = arith.constant 0 : index
    %c0_6 = arith.constant 0 : index
    %4 = vector.load %arg5[%c0_5, %c0_6] : memref<6x256xbf16, #tpu.memory_space<vmem>>, vector<6x256xbf16>
    %cst_7 = arith.constant dense<0.000000e+00> : vector<16x256xf32>
    %5 = tpu.matmul %3, %4, %cst_7 {dimension_numbers = #tpu.dot_dimension_numbers<[1], [0], [0], [1], [0, 0, 1, 1], [], []>} : vector<16x6xbf16>, vector<6x256xbf16>, vector<16x256xf32> -> vector<16x256xf32>
    %6 = arith.addf %2, %5 : vector<16x256xf32>
    %c0_8 = arith.constant 0 : index
    %c0_9 = arith.constant 0 : index
    %7 = vector.load %arg3[%c0_8, %c0_9] : memref<16x1xf32, #tpu.memory_space<vmem>>, vector<16x1xf32>
    %8 = vector.broadcast %7 : vector<16x1xf32> to vector<16x256xf32>
    %9 = arith.mulf %6, %8 : vector<16x256xf32>
    %c0_10 = arith.constant 0 : index
    %c0_11 = arith.constant 0 : index
    %10 = vector.load %arg6[%c0_10, %c0_11] : memref<1x256xf32, #tpu.memory_space<vmem>>, vector<1x256xf32>
    %11 = vector.broadcast %10 : vector<1x256xf32> to vector<16x256xf32>
    %12 = arith.addf %9, %11 : vector<16x256xf32>
    %c0_12 = arith.constant 0 : index
    %c0_13 = arith.constant 0 : index
    %13 = vector.load %arg7[%c0_12, %c0_13] : memref<16x256xf32, #tpu.memory_space<vmem>>, vector<16x256xf32>
    tpu.vector_store %arg7[%c0_12, %c0_13], %12 {strides = array<i32>} : memref<16x256xf32, #tpu.memory_space<vmem>>, vector<16x256xf32>,
    return
  }
  func.func @transform_0(%arg0: i32) -> (i32, i32) {
    %c0_i32 = arith.constant 0 : i32
    %c0_i32_0 = arith.constant 0 : i32
    return %arg0, %c0_i32 : i32, i32
  }
  func.func @transform_1(%arg0: i32) -> (i32, i32) {
    %c0_i32 = arith.constant 0 : i32
    %c0_i32_0 = arith.constant 0 : i32
    return %arg0, %c0_i32 : i32, i32
  }
  func.func @transform_2(%arg0: i32) -> (i32, i32) {
    %c0_i32 = arith.constant 0 : i32
    %c0_i32_0 = arith.constant 0 : i32
    return %arg0, %c0_i32 : i32, i32
  }
  func.func @transform_3(%arg0: i32) -> (i32, i32) {
    %c0_i32 = arith.constant 0 : i32
    %c0_i32_0 = arith.constant 0 : i32
    %c0_i32_1 = arith.constant 0 : i32
    return %c0_i32, %c0_i32_0 : i32, i32
  }
  func.func @transform_4(%arg0: i32) -> (i32, i32) {
    %c0_i32 = arith.constant 0 : i32
    %c0_i32_0 = arith.constant 0 : i32
    %c0_i32_1 = arith.constant 0 : i32
    return %c0_i32, %c0_i32_0 : i32, i32
  }
  func.func @transform_5(%arg0: i32) -> (i32, i32) {
    %c0_i32 = arith.constant 0 : i32
    %c0_i32_0 = arith.constant 0 : i32
    %c0_i32_1 = arith.constant 0 : i32
    return %c0_i32, %c0_i32_0 : i32, i32
  }
  func.func @transform_6(%arg0: i32) -> (i32, i32) {
    %c0_i32 = arith.constant 0 : i32
    %c0_i32_0 = arith.constant 0 : i32
    return %arg0, %c0_i32 : i32, i32
  }
}

</mosaic_0001>

<bundles_post_ra>
// kernel: ui2vec_forward.1
= control target key start
LH: loop header
LB: loop body
LE: loop exit
PB: predicated region body
PF: predicated region fallthrough
CT: control target
= control target key end

     0   :  { %11 = vsyncpa [#allocation3], 0  ;;  %s1294_s0 = inlined_call_operand.vmem [shape: bf16[32,256], index: 0, kind: input, shape index: {}]   ;;  %s1295_s1 = inlined_call_operand.vmem [shape: bf16[32,6], index: 1, kind: input, shape index: {}]   ;;  %s1296_s2 = inlined_call_operand.vmem [shape: f32[32,1], index: 2, kind: input, shape index: {}]   ;;  %s1297_s3 = inlined_call_operand.hbm [shape: bf16[256,256], index: 3, kind: input, shape index: {}]   ;;  %s1298_s4 = inlined_call_operand.vmem [shape: bf16[6,256], index: 4, kind: input, shape index: {}]   ;;  %s1299_s5 = inlined_call_operand.vmem [shape: f32[1,256], index: 5, kind: input, shape index: {}]   ;;  %s1300_s6 = inlined_call_operand.hbm [shape: f32[32,256], index: 6, kind: output, shape index: {}]  }
   0x1   :  { %12 = vsyncpa [#allocation4], 0 }
   0x2   :  { %14 = vsyncpa [#allocation4 + $0x1], 0  ;;  %s1170_s21 = smov 0   ;;  %s1172_s22 = smov 0  }
   0x3   :  { %s1174_s23 = smov 0   ;;  %s1176_s24 = smov 0  }
   0x4 LB: > { %s1191_s25 = sadd.s32 4294967295, %s1127_s24   ;;  %s775_s26 = sadd.s32 4294967294, %s1127_s24   ;;  %s1127_s24 = sphi %s1176_s24, %s1306_s24   ;;  %s1123_s23 = sphi %s1174_s23, %s1305_s23   ;;  %s1119_s22 = sphi %s1172_s22, %s1304_s22   ;;  %s1115_s21 = sphi %s1170_s21, %s1303_s21  }
   0x5   : > { %s1195_s27 = sadd.s32 1, %s1127_s24   ;;  %s168_s28 = sadd.s32 1, %s1123_s23 }
   0x6   : > { %s165_s29 = ssub.s32 %s1127_s24, %s1195_s27  ;;  %p178_p0 = scmp.ne.s32.totalorder %s1123_s23, %s1119_s22 }
   0x7   : > { %p166_p1 = scmp.eq.s32.totalorder %s165_s29, 0  ;;  %p179_p2 = scmp.eq.s32.totalorder %s1191_s25, 1 }
   0x8   : > { %p184_p3 = scmp.ne.s32.totalorder %s1119_s22, %s1115_s21  ;;  %p185_p4 = scmp.eq.s32.totalorder %s775_s26, 1 }
   0x9   : > { %s1206_s30 = scalar_select %p166_p1, %s1123_s23, %s168_s28  }
   0xa   : > { %p1208_p5 = por %p179_p2, %p178_p0  ;;  %p1212_p6 = por %p185_p4, %p184_p3 }
   0xb   : > { %p776_p7 = scmp.ge.s32.totalorder %s1127_s24, 1  ;;  %p192_p8 = scmp.lt.s32.totalorder %s1127_s24, 3 }
   0xc   : > { %p989_p9 = scmp.eq.s32.totalorder %s1191_s25, 0  ;;  %s203_s11 = sshll.u32 %s1297_s3, 4  ;;  %s204_s11 = int_to_ptr.hbm [resolvable:$true] %s203_s11 }
   0xd   : > { %p193_p10 = pnand %p776_p7, %p192_p8  ;;  %s1129_s12 = smov [#allocation2]  }
   0xe   : > { %s205_s13 = sshll.u32 %s1129_s12, 4  ;;  %s1130_s14 = smov 128   ;;  %s206_s13 = int_to_ptr.vmem [resolvable:$true] %s205_s13 }
   0xf   : > { %p981_p11 = pneg %p193_p10  ;;  %s1131_s15 = smov 8  }
  0x10   : > { %255 = sbr.rel (%p193_p10) target bundleno = 212 (0xd4), region = 44 }
  0x11   : > { %p982_p12 = pnand %p989_p9, %p981_p11 }
  0x13   : > { %984 = dma.hbm_to_vmem [thread:$0]  (!%p982_p12), %s204_s11, 4096, %s206_s13, [#allocation3], %s1130_s14, %s1130_s14, %s1131_s15  }
  0x15   : > { %1106 = dma.done.wait (%p989_p9), [#allocation3], 4096  }
  0x16   : > { %1108 = vsyncadd (%p989_p9), [#allocation3], 4294963200  ;;  %s782_s16 = sshll.u32 %s1191_s25, 1  ;;  %vm369_vm0 = vcmask 1042432   ;;  %v861_v0 = vld [vmem:[#allocation2 + $0x70] sm:$0xf] }
  0x17   : > { %p298_p13 = scmp.lt.s32.totalorder %s782_s16, 3  ;;  %v955_v1 = vld [vmem:[#allocation2 + $0x74] sm:$0xf0]  ;;  %v925_v2 = vld [vmem:[#allocation2 + $0xf0] sm:$0xf]  ;;  %vm365_vm1 = vcmask 48128  }
  0x18   : > { %v862_v3 = vor.u32 %v955_v1, %v861_v0  ;;  %v971_v4 = vld [vmem:[#allocation2 + $0xf4] sm:$0xf0]  ;;  %v354_v5 = vld [vmem:[%s1298_s4] sm:$0x77]  ;;  %v953_v10 = vld [vmem:[#allocation2 + $0x64] sm:$0xf0] }
  0x19   : > { %s1308_s16 = smov (!%p298_p13, %s782_s16), 3  ;;  %v853_v6 = vld [vmem:[#allocation2 + $0x60] sm:$0xf]  ;;  %v926_v7 = vor.u32 %v971_v4, %v925_v2  ;;  %v361_v8 = vunpack.c.l.b16 %v354_v5  ;;  %v362_v9 = vunpack.c.h.b16 %v354_v5  ;;  %v969_v12 = vld [vmem:[#allocation2 + $0xe4] sm:$0xf0]  ;;  %v1132_v46 = vmov 0  }
  0x1a   : > { %s786_s17 = sshll.u32 %s1308_s16, 2  ;;  %v917_v11 = vld [vmem:[#allocation2 + $0xe0] sm:$0xf]  ;;  %574 = vmatpush.bf16.msra.mxu2 %v862_v3  ;;  %v954_v13 = vld [vmem:[#allocation2 + $0x74] sm:$0xf]  ;;  %v854_v18 = vor.u32 %v953_v10, %v853_v6  ;;  %1030 = vset.pattern.permute.xlu0 %v1132_v46  ;;  %s937_s29 = sshll.u32 %s1308_s16, 3 }
  0x1b   : > { %v863_v14 = vld [vmem:[#allocation2 + $0x78] sm:$0xf0]  ;;  %v970_v15 = vld [vmem:[#allocation2 + $0xf4] sm:$0xf]  ;;  %588 = vmatpush.bf16.msra.mxu3 %v926_v7  ;;  %v363_v16 = vpack.c.b16 %v361_v8, %v361_v8  ;;  %v364_v17 = vpack.c.b16 %v362_v9, %v362_v9  ;;  %v918_v19 = vor.u32 %v969_v12, %v917_v11  ;;  %v845_v21 = vld [vmem:[#allocation2 + $0x50] sm:$0xf]  ;;  %s308_s28 = scalar_lea.vmem %s1295_s1, %s786_s17  ;;  %s1248_s11 = scalar_lea.vmem %s1296_s2, %s937_s29 }
  0x1c   : > { %v927_v20 = vld [vmem:[#allocation2 + $0xf8] sm:$0xf0]  ;;  %v951_v22 = vld [vmem:[#allocation2 + $0x54] sm:$0xf0]  ;;  %v866_v23 = vor.u32 %v954_v13, %v863_v14  ;;  %v909_v25 = vld [vmem:[#allocation2 + $0xd0] sm:$0xf]  ;;  %s302_s14 = scalar_lea.vmem %s1294_s0, %s937_s29 }
  0x1d   : > { %v930_v24 = vor.u32 %v970_v15, %v927_v20  ;;  %v967_v26 = vld [vmem:[#allocation2 + $0xd4] sm:$0xf0]  ;;  %v952_v27 = vld [vmem:[#allocation2 + $0x64] sm:$0xf]  ;;  %v371_v28 = vsel %vm369_vm0, %v363_v16, 0  ;;  %v374_v29 = vsel %vm369_vm0, %v364_v17, 0  ;;  %v846_v33 = vor.u32 %v951_v22, %v845_v21 }
  0x1e   : > { %v855_v30 = vld [vmem:[#allocation2 + $0x68] sm:$0xf0]  ;;  %v968_v31 = vld [vmem:[#allocation2 + $0xe4] sm:$0xf]  ;;  %383 = vmatpush.bf16.msra.mxu0 %v371_v28  ;;  %397 = vmatpush.bf16.msra.mxu1 %v374_v29  ;;  %v910_v34 = vor.u32 %v967_v26, %v909_v25  ;;  %v837_v35 = vld [vmem:[#allocation2 + $0x40] sm:$0xf] }
  0x1f   : > { %v919_v32 = vld [vmem:[#allocation2 + $0xe8] sm:$0xf0]  ;;  %575 = vmatpush.bf16.msra.mxu2 %v854_v18  ;;  %589 = vmatpush.bf16.msra.mxu3 %v918_v19  ;;  %v949_v36 = vld [vmem:[#allocation2 + $0x44] sm:$0xf0]  ;;  %v901_v37 = vld [vmem:[#allocation2 + $0xc0] sm:$0xf]  ;;  %v858_v38 = vor.u32 %v952_v27, %v855_v30 }
  0x20   : > { %v922_v39 = vor.u32 %v968_v31, %v919_v32  ;;  %v965_v40 = vld [vmem:[#allocation2 + $0xc4] sm:$0xf0]  ;;  %v950_v41 = vld [vmem:[#allocation2 + $0x54] sm:$0xf]  ;;  %v847_v42 = vld [vmem:[#allocation2 + $0x58] sm:$0xf0]  ;;  %v838_v47 = vor.u32 %v949_v36, %v837_v35 }
  0x21   : > { %v966_v43 = vld [vmem:[#allocation2 + $0xd4] sm:$0xf]  ;;  %v911_v44 = vld [vmem:[#allocation2 + $0xd8] sm:$0xf0]  ;;  %v972_v45 = vld [vmem:[%s308_s28] sm:$0xff]  ;;  %v902_v48 = vor.u32 %v965_v40, %v901_v37  ;;  %v850_v51 = vor.u32 %v950_v41, %v847_v42  ;;  %s294_s15 = sand.u32 1, %s1119_s22  }
  0x22   : > { %602 = vmatpush.bf16.msrb.mxu0 %v866_v23  ;;  %616 = vmatpush.bf16.msrb.mxu1 %v930_v24  ;;  %v829_v49 = vld [vmem:[#allocation2 + $0x30] sm:$0xf]  ;;  %v947_v50 = vld [vmem:[#allocation2 + $0x34] sm:$0xf0]  ;;  %v914_v52 = vor.u32 %v966_v43, %v911_v44  ;;  %v948_v55 = vld [vmem:[#allocation2 + $0x44] sm:$0xf] }
  0x23   : > { %576 = vmatpush.bf16.msra.mxu2 %v846_v33  ;;  %590 = vmatpush.bf16.msra.mxu3 %v910_v34  ;;  %v893_v53 = vld [vmem:[#allocation2 + $0xb0] sm:$0xf]  ;;  %v963_v54 = vld [vmem:[#allocation2 + $0xb4] sm:$0xf0]  ;;  %v839_v56 = vld [vmem:[#allocation2 + $0x48] sm:$0xf0]  ;;  %v830_v59 = vor.u32 %v947_v50, %v829_v49 }
  0x24   : > { %793 = vmatmul.msk.bf16.vlgmr.msra.gmra.mxu0 %vm365_vm1, %v972_v45  ;;  %794 = vmatmul.msk.bf16.vlgmr.msra.gmra.mxu1 %vm365_vm1, %v972_v45  ;;  %v964_v57 = vld [vmem:[#allocation2 + $0xc4] sm:$0xf]  ;;  %v903_v58 = vld [vmem:[#allocation2 + $0xc8] sm:$0xf0]  ;;  %v894_v60 = vor.u32 %v963_v54, %v893_v53  ;;  %v821_v61 = vld [vmem:[#allocation2 + $0x20] sm:$0xf]  ;;  %v842_v63 = vor.u32 %v948_v55, %v839_v56 }
  0x25   : > { %v945_v62 = vld [vmem:[#allocation2 + $0x24] sm:$0xf0]  ;;  %v906_v0 = vor.u32 %v964_v57, %v903_v58  ;;  %v885_v1 = vld [vmem:[#allocation2 + $0xa0] sm:$0xf]  ;;  %v946_v3 = vld [vmem:[#allocation2 + $0x34] sm:$0xf] }
  0x26   : > { %603 = vmatpush.bf16.msrb.mxu0 %v858_v38  ;;  %617 = vmatpush.bf16.msrb.mxu1 %v922_v39  ;;  %v961_v2 = vld [vmem:[#allocation2 + $0xa4] sm:$0xf0]  ;;  %v831_v4 = vld [vmem:[#allocation2 + $0x38] sm:$0xf0]  ;;  %v962_v5 = vld [vmem:[#allocation2 + $0xb4] sm:$0xf]  ;;  %v822_v7 = vor.u32 %v945_v62, %v821_v61 }
  0x27   : > { %577 = vmatpush.bf16.msra.mxu2 %v838_v47  ;;  %591 = vmatpush.bf16.msra.mxu3 %v902_v48  ;;  %v895_v6 = vld [vmem:[#allocation2 + $0xb8] sm:$0xf0]  ;;  %v886_v8 = vor.u32 %v961_v2, %v885_v1  ;;  %v813_v9 = vld [vmem:[#allocation2 + $0x10] sm:$0xf]  ;;  %v943_v10 = vld [vmem:[#allocation2 + $0x14] sm:$0xf0]  ;;  %v834_v11 = vor.u32 %v946_v3, %v831_v4 }
  0x28   : > { %v898_v12 = vor.u32 %v962_v5, %v895_v6  ;;  %v877_v13 = vld [vmem:[#allocation2 + $0x90] sm:$0xf]  ;;  %v959_v14 = vld [vmem:[#allocation2 + $0x94] sm:$0xf0]  ;;  %v944_v15 = vld [vmem:[#allocation2 + $0x24] sm:$0xf]  ;;  %v814_v20 = vor.u32 %v943_v10, %v813_v9 }
  0x29   : > { %v823_v16 = vld [vmem:[#allocation2 + $0x28] sm:$0xf0]  ;;  %v960_v17 = vld [vmem:[#allocation2 + $0xa4] sm:$0xf]  ;;  %v878_v21 = vor.u32 %v959_v14, %v877_v13  ;;  %v805_v22 = vld [vmem:[#allocation2] sm:$0xf] }
  0x2a   : > { %604 = vmatpush.bf16.msrb.mxu0 %v850_v51  ;;  %618 = vmatpush.bf16.msrb.mxu1 %v914_v52  ;;  %v887_v18 = vld [vmem:[#allocation2 + $0xa8] sm:$0xf0]  ;;  %v630_v19 = vld [vmem:[%s1248_s11] sm:$0xff]  ;;  %v941_v23 = vld [vmem:[#allocation2 + $0x4] sm:$0xf0]  ;;  %v826_v24 = vor.u32 %v944_v15, %v823_v16  ;;  %s781_s18 = sshll.u32 %s294_s15, 5 }
  0x2b   : > { %578 = vmatpush.bf16.msra.mxu2 %v830_v59  ;;  %592 = vmatpush.bf16.msra.mxu3 %v894_v60  ;;  %v890_v25 = vor.u32 %v960_v17, %v887_v18  ;;  %v869_v26 = vld [vmem:[#allocation2 + $0x80] sm:$0xf]  ;;  %v957_v27 = vld [vmem:[#allocation2 + $0x84] sm:$0xf0]  ;;  %v942_v28 = vld [vmem:[#allocation2 + $0x14] sm:$0xf]  ;;  %v806_v33 = vor.u32 %v941_v23, %v805_v22 }
  0x2c   : > { %v815_v29 = vld [vmem:[#allocation2 + $0x18] sm:$0xf0]  ;;  %v958_v30 = vld [vmem:[#allocation2 + $0x94] sm:$0xf]  ;;  %634 = vperm.xlu0 %1030, %v630_v19   ;;  %v797_v32 = vld [vmem:[%s302_s14] sm:$0xf]  ;;  %v870_v34 = vor.u32 %v957_v27, %v869_v26 }
  0x2d   : > { %v879_v31 = vld [vmem:[#allocation2 + $0x98] sm:$0xf0]  ;;  %v939_v35 = vld [vmem:[%s302_s14 + $0x4] sm:$0xf0]  ;;  %v938_v36 = vld [vmem:[%s302_s14 + $0x4] sm:$0xf]  ;;  %v818_v38 = vor.u32 %v942_v28, %v815_v29 }
  0x2e   : > { %605 = vmatpush.bf16.msrb.mxu0 %v842_v63  ;;  %619 = vmatpush.bf16.msrb.mxu1 %v906_v0  ;;  %v799_v37 = vld [vmem:[%s302_s14 + $0x8] sm:$0xf0]  ;;  %v882_v39 = vor.u32 %v958_v30, %v879_v31  ;;  %v940_v40 = vld [vmem:[#allocation2 + $0x4] sm:$0xf]  ;;  %v798_v44 = vor.u32 %v939_v35, %v797_v32  ;;  %v646_v55 = vld [vmem:[%s1299_s5] sm:$0x3] }
  0x2f   : > { %579 = vmatpush.bf16.msra.mxu2 %v822_v7  ;;  %593 = vmatpush.bf16.msra.mxu3 %v886_v8  ;;  %v807_v41 = vld [vmem:[#allocation2 + $0x8] sm:$0xf0]  ;;  %v956_v42 = vld [vmem:[#allocation2 + $0x84] sm:$0xf]  ;;  %v802_v45 = vor.u32 %v938_v36, %v799_v37  ;;  %v649_v62 = vperm.slane %v646_v55, 1  ;;  %v648_v0 = vperm.slane %v646_v55, 0 }
  0x30   : > { %v871_v43 = vld [vmem:[#allocation2 + $0x88] sm:$0xf0]  ;;  %v810_v47 = vor.u32 %v940_v40, %v807_v41  ;;  %s974_s19 = sshll.u32 %s1191_s25, 5  ;;  %s296_s20 = scalar_lea.vmem [#allocation5], %s781_s18 }
  0x31   : > { %v631_v46 = vld [vmem:[%s1248_s11 + $0x8] sm:$0xff]  ;;  %v874_v48 = vor.u32 %v956_v42, %v871_v43  ;;  %s673_s29 = scalar_lea.hbm %s1300_s6, %s974_s19  ;;  %s674_s9 = sshll.u32 %s296_s20, 4  ;;  %s675_s9 = int_to_ptr.vmem [resolvable:$true] %s674_s9 }
  0x32   : > { %606 = vmatpush.bf16.msrb.mxu0 %v834_v11  ;;  %620 = vmatpush.bf16.msrb.mxu1 %v898_v12  ;;  %s676_s25 = sshll.u32 %s673_s29, 4  ;;  %s661_s10 = scalar_lea.sflag [#allocation4], %s294_s15  ;;  %s677_s25 = int_to_ptr.hbm [resolvable:$true] %s676_s25 }
  0x33   : > { %580 = vmatpush.bf16.msra.mxu2 %v814_v20  ;;  %594 = vmatpush.bf16.msra.mxu3 %v878_v21  ;;  %s1075_s11 = sshra.s32 %s677_s25, 4  ;;  %s1081_s16 = scalar_lea.hbm %s1300_s6, 64  ;;  %s1076_s11 = int_to_ptr.hbm [resolvable:$true] %s1075_s11 }
  0x34   : > { %639 = vperm.xlu0 %1030, %v631_v46   ;;  %s1077_s12 = scalar_lea.hbm %s1076_s11, 32  ;;  %p1082_p3 = scmp.lt.s32.totalorder %s1076_s11, %s1300_s6 }
  0x35   : > { %p1078_p0 = scmp.ne.s32.totalorder %s1076_s11, %s1077_s12  ;;  %p1083_p4 = scmp.lt.s32.totalorder %s1081_s16, %s1077_s12 }
  0x36   : > { %607 = vmatpush.bf16.msrb.mxu0 %v826_v24  ;;  %621 = vmatpush.bf16.msrb.mxu1 %v890_v25 }
  0x37   : > { %581 = vmatpush.bf16.msra.mxu2 %v806_v33  ;;  %595 = vmatpush.bf16.msra.mxu3 %v870_v34  ;;  %p1079_p1 = pnand %p1078_p0, %p1208_p5  ;;  %p1084_p7 = por %p1083_p4, %p1082_p3 }
  0x39   : > { %p1080_p2 = pneg %p1079_p1 }
  0x3a   : > { %608 = vmatpush.bf16.msrb.mxu0 %v818_v38  ;;  %622 = vmatpush.bf16.msrb.mxu1 %v882_v39 }
  0x3b   : > { %582 = vmatmul.bf16.vlgmr.msra.gmra.mxu2 %v798_v44  ;;  %596 = vmatmul.bf16.vlgmr.msra.gmra.mxu3 %v802_v45  ;;  %p1085_p8 = pnand %p1084_p7, %p1080_p2 }
  0x3e   : > { %609 = vmatpush.bf16.msrb.mxu0 %v810_v47  ;;  %623 = vmatpush.bf16.msrb.mxu1 %v874_v48 }
  0x41   : > { %610 = vmatmul.bf16.vlgmr.msrb.gmra.mxu0 %v798_v44  ;;  %624 = vmatmul.bf16.vlgmr.msrb.gmra.mxu1 %v802_v45 }
  0x9e   : > { %v635_v59 = vpop.permute.xlu0 %634 }
  0xa1   : > { %v385_v49 = vpop.f32.mrf.mxu0  ;;  %v399_v50 = vpop.f32.mrf.mxu1 }
  0xa6   : > { %v640_v12 = vpop.permute.xlu0 %639 }
  0xa9   : > { %v387_v51 = vpop.f32.mrf.mxu0  ;;  %v401_v52 = vpop.f32.mrf.mxu1 }
  0xbe   : > { %v611_v53 = vpop.f32.mrf.mxu0  ;;  %v625_v54 = vpop.f32.mrf.mxu1 }
  0xbf   : > { %v612_v56 = vadd.f32 %v611_v53, %v399_v50  ;;  %v583_v57 = vpop.f32.mrf.mxu2  ;;  %v597_v58 = vpop.f32.mrf.mxu3 }
  0xc0   : > { %v584_v60 = vadd.f32 %v583_v57, %v385_v49 }
  0xc1   : > { %v626_v61 = vadd.f32 %v625_v54, %v612_v56 }
  0xc2   : > { %v598_v63 = vadd.f32 %v597_v58, %v584_v60 }
  0xc3   : > { %v643_v1 = vmul.f32 %v635_v59, %v626_v61 }
  0xc4   : > { %v642_v2 = vmul.f32 %v635_v59, %v598_v63 }
  0xc5   : > { %v653_v3 = vadd.f32 %v649_v62, %v643_v1 }
  0xc6   : > { %v652_v4 = vadd.f32 %v648_v0, %v642_v2  ;;  %v613_v5 = vpop.f32.mrf.mxu0  ;;  %v627_v8 = vpop.f32.mrf.mxu1 }
  0xc7   : > { %657 = vst [vmem:[%s296_s20 + $0x8] sm:$0xff] %v653_v3  ;;  %v614_v6 = vadd.f32 %v613_v5, %v401_v52  ;;  %v585_v7 = vpop.f32.mrf.mxu2  ;;  %v599_v11 = vpop.f32.mrf.mxu3 }
  0xc8   : > { %656 = vst [vmem:[%s296_s20] sm:$0xff] %v652_v4  ;;  %v586_v9 = vadd.f32 %v585_v7, %v387_v51 }
  0xc9   : > { %v628_v10 = vadd.f32 %v627_v8, %v614_v6 }
  0xca   : > { %v600_v13 = vadd.f32 %v599_v11, %v586_v9 }
  0xcb   : > { %v645_v14 = vmul.f32 %v640_v12, %v628_v10 }
  0xcc   : > { %v644_v15 = vmul.f32 %v640_v12, %v600_v13 }
  0xcd   : > { %v655_v16 = vadd.f32 %v649_v62, %v645_v14 }
  0xce   : > { %v654_v17 = vadd.f32 %v648_v0, %v644_v15 }
  0xcf   : > { %659 = vst [vmem:[%s296_s20 + $0x18] sm:$0xff] %v655_v16 }
  0xd0   : > { %658 = vst [vmem:[%s296_s20 + $0x10] sm:$0xff] %v654_v17 }
  0xd1   : > { %1088 = shalt.err (!%p1085_p8)
}
  0xd2   : > { %s1133_s15 = smov 256   ;;  %s1134_s19 = smov 16  }
  0xd3   : > { %979 = dma.vmem_to_hbm [thread:$0]  (%p1208_p5), %s675_s9, 512, %s677_s25, %s661_s10, %s1133_s15, %s1133_s15, %s1134_s19  }
  0xd4 PF: > { %p991_p9 = scmp.ge.s32.totalorder %s1127_s24, 2  ;;  %s691_s20 = sand.u32 1, %s1115_s21  }
  0xd5   : > { %s692_s26 = scalar_lea.sflag [#allocation4], %s691_s20 }
  0xd6   : > { %p986_p10 = pnand %p991_p9, %p1212_p6 }
  0xd8   : > { %p987_p11 = pneg %p986_p10 }
  0xda   : > { %1110 = dma.done.wait (%p987_p11), %s692_s26, 512  }
  0xdb   : > { %1112 = vsyncadd (%p987_p11), %s692_s26, 4294966784  ;;  %p17_p12 = scmp.ge.s32.totalorder %s1195_s27, 4   ;;  %s1303_s21 = smov %s1119_s22 }
  0xdc   : > { %s1304_s22 = smov %s1123_s23  ;;  %s1305_s23 = smov %s1206_s30 }
  0xdd   : > { %s1306_s24 = smov %s1195_s27  ;;  %19 = sbr.rel (!%p17_p12) target bundleno = 4 (0x4), region = 90 }
  0xe2   :  { %698 = vsyncpa [#allocation3], 1 }
  0xe3   :  { %700 = vsyncpa [#allocation3 + $0x1], 1 }
  0xe4   :  { %701 = vsyncpa [#allocation4], 1 }
  0xe5   :  { %703 = vsyncpa [#allocation4 + $0x1], 1 }

</bundles_post_ra>
